<compile_context>
chip_gen: v7x
topology: tpu7x:2x2x1
jax: 0.10.0
libtpu: 0.0.40
codegen_flags: <defaults>
</compile_context>

<pallas_src>
import jax
import jax.numpy as jnp
from jax.experimental import pallas as pl
from jax.experimental.pallas import tpu as pltpu


def _proj_kernel(x_ref, w_ref, bp_ref, cp_ref, o_ref):
    # x_ref : (TS, K_pad) bf16 patch rows (row 0 of the stream is a zero "cls slot")
    # w_ref : (K_pad, L)  bf16 pre-transposed weight, resident across the grid
    # bp_ref: (1, L) f32  fused bias + pos_embed
    # cp_ref: (1, L) f32  fused cls_token + pos_embed
    # o_ref : (TS, L)     output sequence tile
    proj = jnp.dot(x_ref[...], w_ref[...], preferred_element_type=jnp.float32)
    o_ref[...] = (proj + bp_ref[...]).astype(o_ref.dtype)

    # Row 0 of the whole sequence is the cls token; only the first seq tile owns it.
    @pl.when(pl.program_id(1) == 0)
    def _():
        o_ref[0:1, :] = cp_ref[...].astype(o_ref.dtype)


def _vmem_bytes(tile_seq, k_pad, latent):
    """Conservative per-step VMEM working set (double-buffered blocks)."""
    return (2 * tile_seq * k_pad * 2      # bf16 patch block x2
            + 2 * tile_seq * latent * 4   # f32 output block x2
            + 2 * k_pad * latent * 2      # bf16 weight (resident)
            + 4 * latent * 4)             # bias_pos + cls_pos rows


def _pick_tile_seq(seq, batch, max_tile=512):
    """Sequence-dim tile (sublanes): full extent when small, else a large
    multiple-of-16 tile; ragged tail is masked by the pl.cdiv grid."""
    tile = seq if seq <= max_tile else max_tile
    # v7x has two TensorCores: make sure the parallel grid has >= 2 steps.
    if batch == 1 and seq > 32 and pl.cdiv(seq, tile) < 2:
        tile = max(16, 16 * pl.cdiv(pl.cdiv(seq, 2), 16))
    return tile


def input_embedding(data, weight, bias, cls_token, pos_embed, patch_size,
                    tile_seq=None, out_dtype=jnp.float32):
    """data: (B, C, H, W) float32 (NCHW, PyTorch convention)."""
    B, C, H, W = data.shape
    P = patch_size
    h, w = H // P, W // P
    N = h * w
    L, K = weight.shape            # nn.Linear: weight (latent, P*P*C)
    S = N + 1                      # cls row + patches
    K_pad = 128 * pl.cdiv(K, 128)  # lane-dense contraction dim

    # einops 'b c (h h1) (w w1) -> b (h w) (h1 w1 c)', cast to bf16, zero-pad K,
    # and prepend one zero row per batch (the cls slot).  These form a single
    # XLA producer; allow_input_fusion below lets XLA fold it into the kernel's
    # input-0 DMA so the rearranged patch tensor need not round-trip HBM.
    # TODO(synk): express the NCHW patch gather directly in the kernel's DMA
    # (Element-indexed BlockSpec) to guarantee zero materialization.
    patches = data.reshape(B, C, h, P, w, P)
    patches = jnp.transpose(patches, (0, 2, 4, 3, 5, 1)).reshape(B, N, K)
    patches = patches.astype(jnp.bfloat16)
    patches = jnp.pad(patches, ((0, 0), (1, 0), (0, K_pad - K)))       # (B, S, K_pad)

    # Weight pre-transposed ONCE to (K_pad, L) bf16; bias+pos fused to one row;
    # cls+pos precomputed for the in-kernel row-0 overwrite.
    w_t = jnp.pad(weight.T.astype(jnp.bfloat16), ((0, K_pad - K), (0, 0)))
    bias_pos = (bias.reshape(1, 1, L) + pos_embed).astype(jnp.float32)  # (B, 1, L)
    cls_pos = (cls_token + pos_embed).astype(jnp.float32)               # (B, 1, L)

    if tile_seq is None:
        tile_seq = _pick_tile_seq(S, B)
    # Keep the double-buffered working set well inside every generation's
    # budget (v5e scoped default 16 MiB, v7x physical 64 MiB).
    while _vmem_bytes(tile_seq, K_pad, L) > 24 * 2**20 and tile_seq > 64:
        tile_seq = max(64, 16 * pl.cdiv(tile_seq // 2, 16))
    n_tiles = pl.cdiv(S, tile_seq)

    vmem_limit = int(min(56 * 2**20,
                         max(32 * 2**20, 2 * _vmem_bytes(tile_seq, K_pad, L))))
    cost = pl.CostEstimate(
        flops=int(2 * B * S * K_pad * L),
        transcendentals=0,
        bytes_accessed=int(patches.size * 2 + w_t.size * 2
                           + (bias_pos.size + cls_pos.size) * 4
                           + B * S * L * jnp.dtype(out_dtype).itemsize))

    return pl.pallas_call(
        _proj_kernel,
        out_shape=jax.ShapeDtypeStruct((B, S, L), out_dtype),
        grid_spec=pltpu.PrefetchScalarGridSpec(
            num_scalar_prefetch=0,
            grid=(B, n_tiles),
            in_specs=[
                # patch rows: batch squeezed, (TS, K_pad) tile per step
                pl.BlockSpec((None, tile_seq, K_pad), lambda b, j: (b, j, 0)),
                # weight: constant block, stays resident across the grid
                pl.BlockSpec((K_pad, L), lambda b, j: (0, 0)),
                # fused bias+pos and cls+pos: one (1, L) row per batch
                pl.BlockSpec((None, 1, L), lambda b, j: (b, 0, 0)),
                pl.BlockSpec((None, 1, L), lambda b, j: (b, 0, 0)),
            ],
            out_specs=pl.BlockSpec((None, tile_seq, L), lambda b, j: (b, j, 0)),
        ),
        compiler_params=pltpu.CompilerParams(
            dimension_semantics=("parallel", "parallel"),
            allow_input_fusion=[True, False, False, False],
            vmem_limit_bytes=vmem_limit),
        cost_estimate=cost,
    )(patches, w_t, bias_pos, cls_pos)


def _reference(data, weight, bias, cls_token, pos_embed, patch_size):
    B, C, H, W = data.shape
    P = patch_size
    h, w = H // P, W // P
    patches = data.reshape(B, C, h, P, w, P)
    patches = jnp.transpose(patches, (0, 2, 4, 3, 5, 1)).reshape(B, h * w, -1)
    proj = jnp.einsum("bnk,lk->bnl", patches, weight) + bias
    proj = jnp.concatenate([cls_token, proj], axis=1)
    return proj + pos_embed  # pos_embed broadcasts over the sequence dim


if __name__ == "__main__":
    # Small shapes consistent with the module's forward semantics.
    batch_size = 2
    n_channels = 3
    patch_size = 4
    spatial = 16          # H = W = 16 -> (16/4)^2 = 16 patches
    latent_size = 128     # lane-dense toy latent (multiple of 128)
    input_size = patch_size * patch_size * n_channels  # 48

    key = jax.random.PRNGKey(0)
    k_data, k_w, k_b, k_cls, k_pos = jax.random.split(key, 5)

    data = jax.random.normal(
        k_data, (batch_size, n_channels, spatial, spatial), jnp.float32)
    # nn.Linear(input_size, latent_size): weight (latent, input), bias (latent,)
    weight = jax.random.normal(k_w, (latent_size, input_size), jnp.float32) * 0.02
    bias = jax.random.normal(k_b, (latent_size,), jnp.float32) * 0.02
    # cls_token / pos_embed: (batch, 1, latent), as in the PyTorch module
    cls_token = jax.random.normal(k_cls, (batch_size, 1, latent_size), jnp.float32)
    pos_embed = jax.random.normal(k_pos, (batch_size, 1, latent_size), jnp.float32)

    out = input_embedding(data, weight, bias, cls_token, pos_embed, patch_size)
    out = jax.block_until_ready(out)

    ref = _reference(data, weight, bias, cls_token, pos_embed, patch_size)
    n_patches = (spatial // patch_size) ** 2
    assert out.shape == (batch_size, n_patches + 1, latent_size)
    # bf16 MXU inputs (f32 accumulate) vs the pure-f32 reference einsum.
    assert jnp.allclose(out, ref, atol=1e-2, rtol=1e-2), "mismatch vs reference"
    print("KERNEL_OK")
</pallas_src>

<mosaic_0001>
module attributes {stable_mosaic.version = 11 : i64} {
  func.func @_proj_kernel(%arg0: i32, %arg1: i32, %arg2: memref<1x17x128xbf16, #tpu.memory_space<vmem>>, %arg3: memref<128x128xbf16, #tpu.memory_space<vmem>>, %arg4: memref<1x1x128xf32, #tpu.memory_space<vmem>>, %arg5: memref<1x1x128xf32, #tpu.memory_space<vmem>>, %arg6: memref<1x17x128xf32, #tpu.memory_space<vmem>>) attributes {dimension_semantics = [#tpu.dimension_semantics<parallel>, #tpu.dimension_semantics<parallel>], iteration_bounds = array<i64: 2, 1>, scalar_prefetch = 0 : i64, scratch_operands = 0 : i64, tpu.core_type = #tpu.core_type<tc>, window_params = [{transform_indices = @transform_0, window_bounds = array<i64: 1, 17, 128>}, {pipeline_mode = #tpu.pipeline_mode<synchronous>, transform_indices = @transform_1, window_bounds = array<i64: 128, 128>}, {transform_indices = @transform_2, window_bounds = array<i64: 1, 1, 128>}, {transform_indices = @transform_3, window_bounds = array<i64: 1, 1, 128>}, {transform_indices = @transform_4, window_bounds = array<i64: 1, 17, 128>}]} {
    %c0 = arith.constant 0 : index
    %c0_0 = arith.constant 0 : index
    %c0_1 = arith.constant 0 : index
    %0 = vector.load %arg2[%c0, %c0_0, %c0_1] : memref<1x17x128xbf16, #tpu.memory_space<vmem>>, vector<1x17x128xbf16>
    %1 = vector.shape_cast %0 : vector<1x17x128xbf16> to vector<17x128xbf16>
    %c0_2 = arith.constant 0 : index
    %c0_3 = arith.constant 0 : index
    %2 = vector.load %arg3[%c0_2, %c0_3] : memref<128x128xbf16, #tpu.memory_space<vmem>>, vector<128x128xbf16>
    %cst = arith.constant dense<0.000000e+00> : vector<17x128xf32>
    %3 = tpu.matmul %1, %2, %cst {dimension_numbers = #tpu.dot_dimension_numbers<[1], [0], [0], [1], [0, 0, 1, 1], [], []>} : vector<17x128xbf16>, vector<128x128xbf16>, vector<17x128xf32> -> vector<17x128xf32>
    %c0_4 = arith.constant 0 : index
    %c0_5 = arith.constant 0 : index
    %c0_6 = arith.constant 0 : index
    %4 = vector.load %arg4[%c0_4, %c0_5, %c0_6] : memref<1x1x128xf32, #tpu.memory_space<vmem>>, vector<1x1x128xf32>
    %5 = vector.shape_cast %4 : vector<1x1x128xf32> to vector<1x128xf32>
    %6 = vector.broadcast %5 : vector<1x128xf32> to vector<17x128xf32>
    %7 = arith.addf %3, %6 : vector<17x128xf32>
    %c0_7 = arith.constant 0 : index
    %c0_8 = arith.constant 0 : index
    %c0_9 = arith.constant 0 : index
    %8 = vector.load %arg6[%c0_7, %c0_8, %c0_9] : memref<1x17x128xf32, #tpu.memory_space<vmem>>, vector<1x17x128xf32>
    %9 = vector.shape_cast %8 : vector<1x17x128xf32> to vector<17x128xf32>
    %10 = vector.shape_cast %7 : vector<17x128xf32> to vector<1x17x128xf32>
    tpu.vector_store %arg6[%c0_7, %c0_8, %c0_9], %10 {strides = array<i32>} : memref<1x17x128xf32, #tpu.memory_space<vmem>>, vector<1x17x128xf32>,
    %c0_i32 = arith.constant 0 : i32
    %11 = arith.cmpi eq, %arg1, %c0_i32 : i32
    %12 = arith.extui %11 : i1 to i32
    %c0_i32_10 = arith.constant 0 : i32
    %13 = arith.cmpi ne, %12, %c0_i32_10 : i32
    scf.if %13 {
      %c0_11 = arith.constant 0 : index
      %c0_12 = arith.constant 0 : index
      %c0_13 = arith.constant 0 : index
      %14 = vector.load %arg5[%c0_11, %c0_12, %c0_13] : memref<1x1x128xf32, #tpu.memory_space<vmem>>, vector<1x1x128xf32>
      %15 = vector.shape_cast %14 : vector<1x1x128xf32> to vector<1x128xf32>
      %c0_14 = arith.constant 0 : index
      %c0_15 = arith.constant 0 : index
      %c0_16 = arith.constant 0 : index
      %16 = vector.load %arg6[%c0_14, %c0_15, %c0_16] : memref<1x17x128xf32, #tpu.memory_space<vmem>>, vector<1x1x128xf32>
      %17 = vector.shape_cast %16 : vector<1x1x128xf32> to vector<1x128xf32>
      %18 = vector.shape_cast %15 : vector<1x128xf32> to vector<1x1x128xf32>
      tpu.vector_store %arg6[%c0_14, %c0_15, %c0_16], %18 {strides = array<i32>} : memref<1x17x128xf32, #tpu.memory_space<vmem>>, vector<1x1x128xf32>,
    } else {
    }
    return
  }
  func.func @transform_0(%arg0: i32, %arg1: i32) -> (i32, i32, i32) {
    %c0_i32 = arith.constant 0 : i32
    %c0_i32_0 = arith.constant 0 : i32
    return %arg0, %arg1, %c0_i32 : i32, i32, i32
  }
  func.func @transform_1(%arg0: i32, %arg1: i32) -> (i32, i32) {
    %c0_i32 = arith.constant 0 : i32
    %c0_i32_0 = arith.constant 0 : i32
    %c0_i32_1 = arith.constant 0 : i32
    return %c0_i32, %c0_i32_0 : i32, i32
  }
  func.func @transform_2(%arg0: i32, %arg1: i32) -> (i32, i32, i32) {
    %c0_i32 = arith.constant 0 : i32
    %c0_i32_0 = arith.constant 0 : i32
    %c0_i32_1 = arith.constant 0 : i32
    return %arg0, %c0_i32, %c0_i32_0 : i32, i32, i32
  }
  func.func @transform_3(%arg0: i32, %arg1: i32) -> (i32, i32, i32) {
    %c0_i32 = arith.constant 0 : i32
    %c0_i32_0 = arith.constant 0 : i32
    %c0_i32_1 = arith.constant 0 : i32
    return %arg0, %c0_i32, %c0_i32_0 : i32, i32, i32
  }
  func.func @transform_4(%arg0: i32, %arg1: i32) -> (i32, i32, i32) {
    %c0_i32 = arith.constant 0 : i32
    %c0_i32_0 = arith.constant 0 : i32
    return %arg0, %arg1, %c0_i32 : i32, i32, i32
  }
}

</mosaic_0001>

<bundles_post_ra>
// kernel: tpu_custom_call.1
= control target key start
LH: loop header
LB: loop body
LE: loop exit
PB: predicated region body
PF: predicated region fallthrough
CT: control target
= control target key end

     0   :  { %9 = vsyncpa [#allocation3], 0  ;;  %s724_s15 = smov 0   ;;  %s726_s16 = smov 0   ;;  %s812_s0 = inlined_call_operand.vmem [shape: bf16[2,17,128], index: 0, kind: input, shape index: {}]   ;;  %s813_s1 = inlined_call_operand.hbm [shape: bf16[128,128], index: 1, kind: input, shape index: {}]   ;;  %s814_s2 = inlined_call_operand.vmem [shape: f32[2,1,128], index: 2, kind: input, shape index: {}]   ;;  %s815_s3 = inlined_call_operand.vmem [shape: f32[2,1,128], index: 3, kind: input, shape index: {}]   ;;  %s816_s4 = inlined_call_operand.vmem [shape: f32[2,17,128], index: 4, kind: output, shape index: {}]  }
   0x1   :  { %s728_s17 = smov 0  }
   0x2 LB: > { %s539_s18 = sadd.s32 4294967295, %s694_s17   ;;  %s27_s19 = sadd.s32 1, %s690_s16  ;;  %s694_s17 = sphi %s728_s17, %s15_s17   ;;  %s690_s16 = sphi %s726_s16, %s826_s16   ;;  %s686_s15 = sphi %s724_s15, %s825_s15  }
   0x3   : > { %p29_p0 = scmp.ge.s32.totalorder %s27_s19, 2  ;;  %p541_p1 = scmp.ge.s32.totalorder %s694_s17, 1 }
   0x4   : > { %p161_p2 = scmp.lt.s32.totalorder %s694_s17, 3  ;;  %p749_p4 = scmp.eq.s32.totalorder %s539_s18, 0 }
   0x5   : > { %s828_s19 = smov (%p29_p0, %s27_s19), 0  ;;  %s696_s22 = smov [#allocation2]  }
   0x6   : > { %p745_p3 = pnand %p541_p1, %p161_p2  ;;  %s173_s23 = sshll.u32 %s696_s22, 4  ;;  %s174_s23 = int_to_ptr.vmem [resolvable:$true] %s173_s23 }
   0x7   : > { %s821_s21 = scalar_select %p749_p4, 1, 0 }
   0x8   : > { %s820_s20 = scalar_select %p745_p3, 1, 0 }
   0x9   : > { %p597_p5 = pneg %p745_p3  ;;  %s640_s27 = scalar_lea.hbm %s813_s1, 1024 }
   0xa   : > { %p641_p7 = scmp.ne.s32.totalorder %s813_s1, %s640_s27  ;;  %p647_p11 = scmp.lt.u32.totalorder %s640_s27, %s813_s1 }
   0xb   : > { %p757_p6 = pnand %p749_p4, %p597_p5 }
   0xd   : > { %p642_p8 = pneg %p757_p6 }
   0xf   : > { %p643_p9 = pnand %p642_p8, %p641_p7 }
  0x11   : > { %p644_p10 = pneg %p643_p9 }
  0x13   : > { %p649_p12 = pnand %p647_p11, %p644_p10 }
  0x15   : > { %652 = shalt.err (!%p649_p12)
}
  0x16   : > { %s653_s6 = scalar_lea.vmem %s174_s23, 1024  ;;  %p661_p2 = scmp.lt.s32.totalorder %s174_s23, %s174_s23 }
  0x17   : > { %p654_p13 = scmp.ne.s32.totalorder %s174_s23, %s653_s6  ;;  %p662_p5 = scmp.lt.s32.totalorder %s653_s6, %s653_s6 }
  0x19   : > { %p656_p0 = pnand %p654_p13, %p642_p8  ;;  %p663_p4 = por %p662_p5, %p661_p2 }
  0x1b   : > { %p657_p1 = pneg %p656_p0 }
  0x1d   : > { %p664_p3 = pnand %p663_p4, %p657_p1 }
  0x1f   : > { %667 = shalt.err (!%p664_p3)
}
  0x20   : > { %s697_s7 = smov 64   ;;  %s698_s8 = smov 4  }
  0x21   : > { %600 = dma.hbm_to_vmem [thread:$0]  (!%p757_p6), %s813_s1, 1024, %s174_s23, [#allocation3], %s697_s7, %s697_s7, %s698_s8  }
  0x22   : > { %p823_p7 = scmp.ne.s32.totalorder %s820_s20, 0 }
  0x23   : > { %p824_p9 = scmp.ne.s32.totalorder (!%p823_p7), %s821_s21, 0 }
  0x24   : > { %214 = sbr.rel (%p823_p7) target bundleno = 295 (0x127), region = 36 }
  0x2b   : > { %681 = dma.done.wait (%p824_p9), [#allocation3], 1024  }
  0x2c   : > { %683 = vsyncadd (%p824_p9), [#allocation3], 4294966272  ;;  %p255_p3 = scmp.lt.s32.totalorder %s686_s15, 1  ;;  %v630_v0 = vld [vmem:[#allocation2] sm:$0xff]   ;;  %v631_v1 = vld [vmem:[#allocation2 + $0x8] sm:$0xff]  }
  0x2d   : > { %571 = vmatprep.subr.bf16.mxu0 %v630_v0  ;;  %v632_v2 = vld [vmem:[#allocation2 + $0x10] sm:$0xff]   ;;  %v633_v3 = vld [vmem:[#allocation2 + $0x18] sm:$0xff]   ;;  %v634_v5 = vld [vmem:[#allocation2 + $0x20] sm:$0xff]  }
  0x2e   : > { %s830_s15 = smov (!%p255_p3, %s686_s15), 1  ;;  %572 = vmatpush3.bf16.msra.mxu0 %v630_v0  ;;  %v635_v6 = vld [vmem:[#allocation2 + $0x28] sm:$0xff]   ;;  %v636_v7 = vld [vmem:[#allocation2 + $0x30] sm:$0xff]   ;;  %v637_v8 = vld [vmem:[#allocation2 + $0x38] sm:$0xff]  }
  0x2f   : > { %s591_s11 = smul.u32 12, %s830_s15  ;;  %573 = vmatprep.subr.bf16.mxu0 %v631_v1  ;;  %s266_s21 = scalar_lea.vmem %s814_s2, %s830_s15 }
  0x30   : > { %s592_s22 = smul.u32 24, %s830_s15  ;;  %v548_v10 = vld [vmem:[%s266_s21] ss:$0 sm:$0xff]  ;;  %s269_s25 = scalar_lea.vmem %s815_s3, %s830_s15 }
  0x31   : > { %s262_s14 = scalar_lea.vmem %s812_s0, %s591_s11  ;;  %v420_v15 = vld [vmem:[%s269_s25] sm:$0x1] }
  0x32   : > { %574 = vmatpush3.bf16.msra.mxu0 %v631_v1  ;;  %v638_v4 = vld [vmem:[%s262_s14] sm:$0xff]   ;;  %v639_v9 = vld [vmem:[%s262_s14 + $0x8] ss:$0 sps:$4 sm:$0x11]   ;;  %s278_s28 = scalar_lea.vmem %s816_s4, %s592_s22 }
  0x33   : > { %575 = vmatprep.subr.bf16.mxu0 %v632_v2  ;;  %587 = vmatprep.mubr.bf16.mxu0 %v638_v4 }
  0x36   : > { %576 = vmatpush3.bf16.msra.mxu0 %v632_v2 }
  0x37   : > { %577 = vmatprep.subr.bf16.mxu0 %v633_v3 }
  0x3a   : > { %578 = vmatpush3.bf16.msra.mxu0 %v633_v3 }
  0x3b   : > { %579 = vmatprep.subr.bf16.mxu0 %v634_v5 }
  0x3e   : > { %580 = vmatpush3.bf16.msra.mxu0 %v634_v5 }
  0x3f   : > { %581 = vmatprep.subr.bf16.mxu0 %v635_v6 }
  0x42   : > { %582 = vmatpush3.bf16.msra.mxu0 %v635_v6 }
  0x43   : > { %583 = vmatprep.subr.bf16.mxu0 %v636_v7 }
  0x46   : > { %584 = vmatpush3.bf16.msra.mxu0 %v636_v7 }
  0x47   : > { %585 = vmatprep.subr.bf16.mxu0 %v637_v8 }
  0x4a   : > { %586 = vmatpush3.bf16.msra.mxu0 %v637_v8 }
  0x4d   : > { %588 = vmatmul.mubr.bf16.vlgmr.msra.gmra.mrb[0].mxu0 %v639_v9 }
 0x120   : > { %v589_v11 = vpop.f32.mrb[0].mxu0 }
 0x121   : > { %v408_v12 = vadd.f32 %v589_v11, %v548_v10  ;;  %v399_v13 = vpop.f32.mrb[1].mxu0 }
 0x122   : > { %v400_v14 = vadd.f32 %v548_v10, %v399_v13  ;;  %v590_v16 = vpop.f32.mrb[2].mxu0 }
 0x123   : > { %415 = vst [vmem:[%s278_s28 + $0x10] sm:$0x1] %v408_v12  ;;  %v402_v17 = vpop.f32.mrb[3].mxu0 }
 0x124   : > { %413 = vst [vmem:[%s278_s28] sm:$0xff] %v400_v14  ;;  %v403_v18 = vadd.f32 %v548_v10, %v402_v17 }
 0x125   : > { %421 = vst [vmem:[%s278_s28] sm:$0x1] %v420_v15 }
 0x126   : > { %414 = vst [vmem:[%s278_s28 + $0x8] sm:$0xff] %v403_v18 }
 0x127 PF: > { %s15_s17 = sadd.s32 1, %s694_s17   ;;  %s825_s15 = smov %s690_s16 }
 0x128   : > { %p12_p4 = scmp.ge.s32.totalorder %s15_s17, 4   ;;  %s826_s16 = smov %s828_s19 }
 0x12a   :  { %14 = sbr.rel (!%p12_p4) target bundleno = 2 (0x2), region = 81 }
 0x131   :  { %452 = vsyncpa [#allocation3], 1 }
 0x132   :  { %454 = vsyncpa [#allocation3 + $0x1], 1 }

</bundles_post_ra>
